<compile_context>
chip_gen: v5e
topology: v5e:2x2
jax: 0.10.0
libtpu: 0.0.40
codegen_flags: <defaults>
</compile_context>

<pallas_src>
import jax
import jax.numpy as jnp
from jax import lax
from jax.experimental import pallas as pl
from jax.experimental.pallas import tpu as pltpu


def _hier_att_kernel(x_ref, w1b_ref, w2b_ref, w1c_ref, w2c_ref, o_ref):
    # x_ref block: (Bt, C, F*Band)  -- lane-dense last dim.
    x = x_ref[...].astype(jnp.float32)                    # (Bt, C, FB)
    Bt, C, FB = x.shape
    Band = w1b_ref.shape[0]
    F = FB // Band
    inv_cf = 1.0 / (C * F)
    inv_fb = 1.0 / FB

    w1b = w1b_ref[...].astype(jnp.float32)                # (Band, Hb)
    w2b = w2b_ref[...].astype(jnp.float32)                # (Hb, Band)
    w1c = w1c_ref[...].astype(jnp.float32)                # (Hc, C)
    w2c = w2c_ref[...].astype(jnp.float32)                # (C, Hc)

    # One-hot selector mapping lane l -> band (l % Band); shape (Band, FB).
    lane_id = lax.broadcasted_iota(jnp.int32, (Band, FB), 1)
    band_id = lax.broadcasted_iota(jnp.int32, (Band, FB), 0)
    onehot = jnp.where(lane_id % Band == band_id, 1.0, 0.0)   # f32 (Band, FB)

    # ---------------- band SE attention ----------------
    # squeeze: mean over (channel, feature) per band
    t = jnp.sum(x, axis=1)                                            # (Bt, FB)
    s_b = jnp.sum(t[:, None, :] * onehot[None, :, :], axis=2) * inv_cf  # (Bt, Band)
    # excite on the VPU: broadcast-multiply + reduce (no MXU)
    h_b = jnp.maximum(
        jnp.sum(s_b[:, :, None] * w1b[None, :, :], axis=1), 0.0)      # (Bt, Hb)
    a_b = jax.nn.sigmoid(
        jnp.sum(h_b[:, :, None] * w2b[None, :, :], axis=1))           # (Bt, Band)
    # per-lane band scale: scale[b, l] = a_b[b, l % Band]
    band_scale = jnp.sum(a_b[:, :, None] * onehot[None, :, :], axis=1)  # (Bt, FB)
    x = x * band_scale[:, None, :]

    # ---------------- channel SE attention ----------------
    # squeeze: mean over (feature, band) per channel  -> lane reduction
    s_c = jnp.sum(x, axis=2) * inv_fb                                  # (Bt, C)
    h_c = jnp.maximum(
        jnp.sum(s_c[:, None, :] * w1c[None, :, :], axis=2), 0.0)       # (Bt, Hc)
    a_c = jax.nn.sigmoid(
        jnp.sum(h_c[:, None, :] * w2c[None, :, :], axis=2))            # (Bt, C)
    x = x * a_c[:, :, None]

    # lane-dense store of the already-flattened [C, F*Band] result
    o_ref[...] = x.astype(o_ref.dtype)


def hierarchical_attention(x, w1b, w2b, w1c, w2c, *, batch_tile=None):
    """x: [B, C, F, Band] -> [B, C, F*Band]  (bands == 5 path)."""
    B, C, F, Band = x.shape
    FB = F * Band

    # Layout plumbing once in the wrapper: present a lane-dense last dim.
    xf = x.reshape(B, C, FB)

    # One fat grid step for small B (amortize step/DMA overhead on the single
    # sequential TC of v5e/v6e); pass batch_tile to split across steps for
    # large B (marked "parallel" so both v7x TensorCores get work).
    bt = B if batch_tile is None else max(1, min(batch_tile, B))
    grid = (pl.cdiv(B, bt),)

    out = pl.pallas_call(
        _hier_att_kernel,
        out_shape=jax.ShapeDtypeStruct((B, C, FB), x.dtype),
        grid_spec=pltpu.PrefetchScalarGridSpec(
            num_scalar_prefetch=0,
            grid=grid,
            in_specs=[
                pl.BlockSpec((bt, C, FB), lambda b: (b, 0, 0)),
                pl.BlockSpec(w1b.shape, lambda b: (0, 0)),
                pl.BlockSpec(w2b.shape, lambda b: (0, 0)),
                pl.BlockSpec(w1c.shape, lambda b: (0, 0)),
                pl.BlockSpec(w2c.shape, lambda b: (0, 0)),
            ],
            out_specs=pl.BlockSpec((bt, C, FB), lambda b: (b, 0, 0)),
        ),
        compiler_params=pltpu.CompilerParams(
            dimension_semantics=("parallel",)
        ),
    )(xf, w1b, w2b, w1c, w2c)

    return out  # already [B, C, F*Band]; no post-kernel reshape


def _reference(x, w1b, w2b, w1c, w2c):
    """Pure-JAX reference of the same forward pass (correctness check)."""
    B, C, F, Band = x.shape
    # band SE
    s_b = jnp.mean(x, axis=(1, 2))                               # (B, Band)
    a_b = jax.nn.sigmoid(jnp.maximum(s_b @ w1b, 0.0) @ w2b)      # (B, Band)
    x = x * a_b[:, None, None, :]
    # channel SE
    s_c = jnp.mean(x, axis=(2, 3))                               # (B, C)
    a_c = jax.nn.sigmoid(jnp.maximum(s_c @ w1c.T, 0.0) @ w2c.T)  # (B, C)
    x = x * a_c[:, :, None, None]
    return x.reshape(B, C, F * Band)


if __name__ == "__main__":
    # args: bands=5, channels_num=8, se_squeeze_ratio=2, feature dim=16
    B, C, F, Band = 2, 8, 16, 5
    Hb = 2                       # SELayer(bands=5, 2)
    Hc = C // 2                  # SELayer(channels_num, channels_num // se_squeeze_ratio)

    key = jax.random.PRNGKey(0)
    kx, k1, k2, k3, k4 = jax.random.split(key, 5)
    x = jax.random.normal(kx, (B, C, F, Band), dtype=jnp.float32)
    # SE weights (bias-free Linear layers).
    w1b = jax.random.normal(k1, (Band, Hb), dtype=jnp.float32) * 0.1  # band fc1 (W.T)
    w2b = jax.random.normal(k2, (Hb, Band), dtype=jnp.float32) * 0.1  # band fc2 (W.T)
    w1c = jax.random.normal(k3, (Hc, C), dtype=jnp.float32) * 0.1     # channel fc1 (W)
    w2c = jax.random.normal(k4, (C, Hc), dtype=jnp.float32) * 0.1     # channel fc2 (W)

    out = hierarchical_attention(x, w1b, w2b, w1c, w2c)
    out = jax.block_until_ready(out)

    ref = _reference(x, w1b, w2b, w1c, w2c)
    assert out.shape == (B, C, F * Band)
    assert jnp.allclose(out, ref, atol=1e-5, rtol=1e-5), "mismatch vs reference"

    # TODO(synk): PCA_svd (torch.svd) is not used in forward(); not implemented.
    print("KERNEL_OK")
</pallas_src>

<mosaic_0001>
module attributes {stable_mosaic.version = 11 : i64} {
  func.func @_hier_att_kernel(%arg0: i32, %arg1: memref<2x8x80xf32, #tpu.memory_space<vmem>>, %arg2: memref<5x2xf32, #tpu.memory_space<vmem>>, %arg3: memref<2x5xf32, #tpu.memory_space<vmem>>, %arg4: memref<4x8xf32, #tpu.memory_space<vmem>>, %arg5: memref<8x4xf32, #tpu.memory_space<vmem>>, %arg6: memref<2x8x80xf32, #tpu.memory_space<vmem>>) attributes {dimension_semantics = [#tpu.dimension_semantics<parallel>], iteration_bounds = array<i64: 1>, scalar_prefetch = 0 : i64, scratch_operands = 0 : i64, tpu.core_type = #tpu.core_type<tc>, window_params = [{transform_indices = @transform_0, window_bounds = array<i64: 2, 8, 80>}, {pipeline_mode = #tpu.pipeline_mode<synchronous>, transform_indices = @transform_1, window_bounds = array<i64: 5, 2>}, {pipeline_mode = #tpu.pipeline_mode<synchronous>, transform_indices = @transform_2, window_bounds = array<i64: 2, 5>}, {pipeline_mode = #tpu.pipeline_mode<synchronous>, transform_indices = @transform_3, window_bounds = array<i64: 4, 8>}, {pipeline_mode = #tpu.pipeline_mode<synchronous>, transform_indices = @transform_4, window_bounds = array<i64: 8, 4>}, {transform_indices = @transform_5, window_bounds = array<i64: 2, 8, 80>}]} {
    %c0 = arith.constant 0 : index
    %c0_0 = arith.constant 0 : index
    %c0_1 = arith.constant 0 : index
    %0 = vector.load %arg1[%c0, %c0_0, %c0_1] : memref<2x8x80xf32, #tpu.memory_space<vmem>>, vector<2x8x80xf32>
    %c0_2 = arith.constant 0 : index
    %c0_3 = arith.constant 0 : index
    %1 = vector.load %arg2[%c0_2, %c0_3] : memref<5x2xf32, #tpu.memory_space<vmem>>, vector<5x2xf32>
    %c0_4 = arith.constant 0 : index
    %c0_5 = arith.constant 0 : index
    %2 = vector.load %arg3[%c0_4, %c0_5] : memref<2x5xf32, #tpu.memory_space<vmem>>, vector<2x5xf32>
    %c0_6 = arith.constant 0 : index
    %c0_7 = arith.constant 0 : index
    %3 = vector.load %arg4[%c0_6, %c0_7] : memref<4x8xf32, #tpu.memory_space<vmem>>, vector<4x8xf32>
    %c0_8 = arith.constant 0 : index
    %c0_9 = arith.constant 0 : index
    %4 = vector.load %arg5[%c0_8, %c0_9] : memref<8x4xf32, #tpu.memory_space<vmem>>, vector<8x4xf32>
    %5 = tpu.iota {dimensions = array<i32: 1>} : vector<5x80xi32>
    %6 = tpu.iota {dimensions = array<i32: 0>} : vector<5x80xi32>
    %c5_i32 = arith.constant 5 : i32
    %c0_i32 = arith.constant 0 : i32
    %7 = arith.cmpi eq, %c5_i32, %c0_i32 : i32
    %c1_i32 = arith.constant 1 : i32
    %8 = arith.select %7, %c1_i32, %c5_i32 : i32
    %9 = vector.broadcast %8 : i32 to vector<5x80xi32>
    %10 = arith.remsi %5, %9 : vector<5x80xi32>
    %c0_i32_10 = arith.constant 0 : i32
    %11 = vector.broadcast %c0_i32_10 : i32 to vector<5x80xi32>
    %12 = arith.cmpi ne, %10, %11 : vector<5x80xi32>
    %c0_i32_11 = arith.constant 0 : i32
    %13 = vector.broadcast %c0_i32_11 : i32 to vector<5x80xi32>
    %14 = arith.cmpi slt, %10, %13 : vector<5x80xi32>
    %c0_i32_12 = arith.constant 0 : i32
    %15 = arith.cmpi slt, %8, %c0_i32_12 : i32
    %16 = vector.broadcast %15 : i1 to vector<5x80xi1>
    %17 = vector.broadcast %16 : vector<5x80xi1> to vector<5x80xi1>
    %18 = arith.xori %14, %17 : vector<5x80xi1>
    %19 = arith.andi %18, %12 : vector<5x80xi1>
    %20 = vector.broadcast %8 : i32 to vector<5x80xi32>
    %21 = arith.addi %10, %20 : vector<5x80xi32>
    %22 = arith.select %19, %21, %10 : vector<5x80xi1>, vector<5x80xi32>
    %23 = arith.cmpi eq, %22, %6 : vector<5x80xi32>
    %cst = arith.constant 1.000000e+00 : f32
    %cst_13 = arith.constant 0.000000e+00 : f32
    %24 = vector.broadcast %cst : f32 to vector<5x80xf32>
    %25 = vector.broadcast %cst_13 : f32 to vector<5x80xf32>
    %26 = arith.select %23, %24, %25 : vector<5x80xi1>, vector<5x80xf32>
    %cst_14 = arith.constant dense<0.000000e+00> : vector<2x80xf32>
    %27 = vector.multi_reduction <add>, %0, %cst_14 [1] : vector<2x8x80xf32> to vector<2x80xf32>
    %28 = vector.shape_cast %27 : vector<2x80xf32> to vector<2x1x80xf32>
    %29 = vector.shape_cast %26 : vector<5x80xf32> to vector<1x5x80xf32>
    %30 = vector.broadcast %28 : vector<2x1x80xf32> to vector<2x5x80xf32>
    %31 = vector.broadcast %29 : vector<1x5x80xf32> to vector<2x5x80xf32>
    %32 = arith.mulf %30, %31 : vector<2x5x80xf32>
    %cst_15 = arith.constant dense<0.000000e+00> : vector<2x5xf32>
    %33 = vector.multi_reduction <add>, %32, %cst_15 [2] : vector<2x5x80xf32> to vector<2x5xf32>
    %cst_16 = arith.constant 7.812500e-03 : f32
    %34 = vector.broadcast %cst_16 : f32 to vector<2x5xf32>
    %35 = arith.mulf %33, %34 : vector<2x5xf32>
    %36 = vector.shape_cast %35 : vector<2x5xf32> to vector<2x5x1xf32>
    %37 = vector.shape_cast %1 : vector<5x2xf32> to vector<1x5x2xf32>
    %38 = vector.broadcast %36 : vector<2x5x1xf32> to vector<2x5x2xf32>
    %39 = vector.broadcast %37 : vector<1x5x2xf32> to vector<2x5x2xf32>
    %40 = arith.mulf %38, %39 : vector<2x5x2xf32>
    %cst_17 = arith.constant dense<0.000000e+00> : vector<2x2xf32>
    %41 = vector.multi_reduction <add>, %40, %cst_17 [1] : vector<2x5x2xf32> to vector<2x2xf32>
    %cst_18 = arith.constant 0.000000e+00 : f32
    %42 = vector.broadcast %cst_18 : f32 to vector<2x2xf32>
    %43 = arith.maximumf %41, %42 : vector<2x2xf32>
    %44 = vector.shape_cast %43 : vector<2x2xf32> to vector<2x2x1xf32>
    %45 = vector.shape_cast %2 : vector<2x5xf32> to vector<1x2x5xf32>
    %46 = vector.broadcast %44 : vector<2x2x1xf32> to vector<2x2x5xf32>
    %47 = vector.broadcast %45 : vector<1x2x5xf32> to vector<2x2x5xf32>
    %48 = arith.mulf %46, %47 : vector<2x2x5xf32>
    %cst_19 = arith.constant dense<0.000000e+00> : vector<2x5xf32>
    %49 = vector.multi_reduction <add>, %48, %cst_19 [1] : vector<2x2x5xf32> to vector<2x5xf32>
    %50 = arith.negf %49 : vector<2x5xf32>
    %51 = math.exp %50 : vector<2x5xf32>
    %cst_20 = arith.constant 1.000000e+00 : f32
    %52 = vector.broadcast %cst_20 : f32 to vector<2x5xf32>
    %53 = arith.addf %52, %51 : vector<2x5xf32>
    %54 = arith.divf %52, %53 : vector<2x5xf32>
    %55 = vector.shape_cast %54 : vector<2x5xf32> to vector<2x5x1xf32>
    %56 = vector.shape_cast %26 : vector<5x80xf32> to vector<1x5x80xf32>
    %57 = vector.broadcast %55 : vector<2x5x1xf32> to vector<2x5x80xf32>
    %58 = vector.broadcast %56 : vector<1x5x80xf32> to vector<2x5x80xf32>
    %59 = arith.mulf %57, %58 : vector<2x5x80xf32>
    %cst_21 = arith.constant dense<0.000000e+00> : vector<2x80xf32>
    %60 = vector.multi_reduction <add>, %59, %cst_21 [1] : vector<2x5x80xf32> to vector<2x80xf32>
    %61 = vector.shape_cast %60 : vector<2x80xf32> to vector<2x1x80xf32>
    %62 = vector.broadcast %61 : vector<2x1x80xf32> to vector<2x8x80xf32>
    %63 = arith.mulf %0, %62 : vector<2x8x80xf32>
    %cst_22 = arith.constant dense<0.000000e+00> : vector<2x8xf32>
    %64 = vector.multi_reduction <add>, %63, %cst_22 [2] : vector<2x8x80xf32> to vector<2x8xf32>
    %cst_23 = arith.constant 1.250000e-02 : f32
    %65 = vector.broadcast %cst_23 : f32 to vector<2x8xf32>
    %66 = arith.mulf %64, %65 : vector<2x8xf32>
    %67 = vector.shape_cast %66 : vector<2x8xf32> to vector<2x1x8xf32>
    %68 = vector.shape_cast %3 : vector<4x8xf32> to vector<1x4x8xf32>
    %69 = vector.broadcast %67 : vector<2x1x8xf32> to vector<2x4x8xf32>
    %70 = vector.broadcast %68 : vector<1x4x8xf32> to vector<2x4x8xf32>
    %71 = arith.mulf %69, %70 : vector<2x4x8xf32>
    %cst_24 = arith.constant dense<0.000000e+00> : vector<2x4xf32>
    %72 = vector.multi_reduction <add>, %71, %cst_24 [2] : vector<2x4x8xf32> to vector<2x4xf32>
    %cst_25 = arith.constant 0.000000e+00 : f32
    %73 = vector.broadcast %cst_25 : f32 to vector<2x4xf32>
    %74 = arith.maximumf %72, %73 : vector<2x4xf32>
    %75 = vector.shape_cast %74 : vector<2x4xf32> to vector<2x1x4xf32>
    %76 = vector.shape_cast %4 : vector<8x4xf32> to vector<1x8x4xf32>
    %77 = vector.broadcast %75 : vector<2x1x4xf32> to vector<2x8x4xf32>
    %78 = vector.broadcast %76 : vector<1x8x4xf32> to vector<2x8x4xf32>
    %79 = arith.mulf %77, %78 : vector<2x8x4xf32>
    %cst_26 = arith.constant dense<0.000000e+00> : vector<2x8xf32>
    %80 = vector.multi_reduction <add>, %79, %cst_26 [2] : vector<2x8x4xf32> to vector<2x8xf32>
    %81 = arith.negf %80 : vector<2x8xf32>
    %82 = math.exp %81 : vector<2x8xf32>
    %cst_27 = arith.constant 1.000000e+00 : f32
    %83 = vector.broadcast %cst_27 : f32 to vector<2x8xf32>
    %84 = arith.addf %83, %82 : vector<2x8xf32>
    %85 = arith.divf %83, %84 : vector<2x8xf32>
    %86 = vector.shape_cast %85 : vector<2x8xf32> to vector<2x8x1xf32>
    %87 = vector.broadcast %86 : vector<2x8x1xf32> to vector<2x8x80xf32>
    %88 = arith.mulf %63, %87 : vector<2x8x80xf32>
    %c0_28 = arith.constant 0 : index
    %c0_29 = arith.constant 0 : index
    %c0_30 = arith.constant 0 : index
    %89 = vector.load %arg6[%c0_28, %c0_29, %c0_30] : memref<2x8x80xf32, #tpu.memory_space<vmem>>, vector<2x8x80xf32>
    tpu.vector_store %arg6[%c0_28, %c0_29, %c0_30], %88 {strides = array<i32>} : memref<2x8x80xf32, #tpu.memory_space<vmem>>, vector<2x8x80xf32>,
    return
  }
  func.func @transform_0(%arg0: i32) -> (i32, i32, i32) {
    %c0_i32 = arith.constant 0 : i32
    %c0_i32_0 = arith.constant 0 : i32
    %c0_i32_1 = arith.constant 0 : i32
    return %arg0, %c0_i32, %c0_i32_0 : i32, i32, i32
  }
  func.func @transform_1(%arg0: i32) -> (i32, i32) {
    %c0_i32 = arith.constant 0 : i32
    %c0_i32_0 = arith.constant 0 : i32
    %c0_i32_1 = arith.constant 0 : i32
    return %c0_i32, %c0_i32_0 : i32, i32
  }
  func.func @transform_2(%arg0: i32) -> (i32, i32) {
    %c0_i32 = arith.constant 0 : i32
    %c0_i32_0 = arith.constant 0 : i32
    %c0_i32_1 = arith.constant 0 : i32
    return %c0_i32, %c0_i32_0 : i32, i32
  }
  func.func @transform_3(%arg0: i32) -> (i32, i32) {
    %c0_i32 = arith.constant 0 : i32
    %c0_i32_0 = arith.constant 0 : i32
    %c0_i32_1 = arith.constant 0 : i32
    return %c0_i32, %c0_i32_0 : i32, i32
  }
  func.func @transform_4(%arg0: i32) -> (i32, i32) {
    %c0_i32 = arith.constant 0 : i32
    %c0_i32_0 = arith.constant 0 : i32
    %c0_i32_1 = arith.constant 0 : i32
    return %c0_i32, %c0_i32_0 : i32, i32
  }
  func.func @transform_5(%arg0: i32) -> (i32, i32, i32) {
    %c0_i32 = arith.constant 0 : i32
    %c0_i32_0 = arith.constant 0 : i32
    %c0_i32_1 = arith.constant 0 : i32
    return %arg0, %c0_i32, %c0_i32_0 : i32, i32, i32
  }
}

</mosaic_0001>

<bundles_post_ra>
// kernel: tpu_custom_call.1
= control target key start
LH: loop header
LB: loop body
LE: loop exit
PB: predicated region body
PF: predicated region fallthrough
CT: control target
= control target key end

     0   :  { %10 = vsyncpa [#allocation3], 0  ;;  %s842_s0 = inlined_call_operand.vmem [shape: f32[2,8,80], index: 0, kind: input, shape index: {}]   ;;  %s843_s1 = inlined_call_operand.vmem [shape: f32[5,2], index: 1, kind: input, shape index: {}]   ;;  %s844_s2 = inlined_call_operand.hbm [shape: f32[2,5], index: 2, kind: input, shape index: {}]   ;;  %s845_s3 = inlined_call_operand.vmem [shape: f32[4,8], index: 3, kind: input, shape index: {}]   ;;  %s846_s4 = inlined_call_operand.vmem [shape: f32[8,4], index: 4, kind: input, shape index: {}]   ;;  %s847_s5 = inlined_call_operand.hbm [shape: f32[2,8,80], index: 5, kind: output, shape index: {}]  }
   0x1   :  { %11 = vsyncpa [#allocation4], 0  ;;  %s21_s20 = sshll.u32 %s844_s2, 4  ;;  %s671_s21 = smov [#allocation2]   ;;  %s22_s20 = int_to_ptr.hbm [resolvable:$true] %s21_s20 }
   0x2   :  { %s23_s22 = sshll.u32 %s671_s21, 4  ;;  %s24_s22 = int_to_ptr.vmem [resolvable:$true] %s23_s22 }
   0x3   :  { %26 = dma.hbm_to_vmem [thread:$0]  %s22_s20, 32, %s24_s22, [#allocation3]  }
   0x4   :  { %667 = dma.done.wait [#allocation3], 32  }
   0x5   :  { %668 = vsyncadd [#allocation3], 4294967264  ;;  %v41_v0 = vlaneseq  ;;  %vm81_vm0 = vcmask 654336   ;;  %v722_v8 = vld [vmem:[%s842_s0] sm:$0xff]  ;;  %v727_v9 = vld [vmem:[%s842_s0 + $0x8] sm:$0xff]  ;;  %v672_v17 = vmov 0  }
   0x6   :  { %v82_v13 = vsel %vm81_vm0, %v722_v8, 0.0  ;;  %v89_v14 = vsel %vm81_vm0, %v727_v9, 0.0  ;;  %v673_v41 = vmov 0.0   ;;  %vm98_vm7 = vcmask 651264   ;;  %v37_v48 = vld [vmem:[%s843_s1] sm:$0x1f] }
   0x7   :  { %v710_v1 = vand.u32 127, %v41_v0  ;;  %v712_v2 = vshrl.u32 %v41_v0, 7  ;;  %v83_v16 = vrot.slane %v82_v13, 4  ;;  %v90_v19 = vrot.slane %v89_v14, 4  ;;  %s568_s7 = sshll.u32 %s847_s5, 4  ;;  %s675_s8 = smov 128   ;;  %s569_s7 = int_to_ptr.hbm [resolvable:$true] %s568_s7 }
   0x8   :  { %vm109_vm8 = vcmask 12288   ;;  %vm140_vm9 = vcmask 33792   ;;  %s676_s9 = smov 8  }
   0x9   :  { %v48_v3 = vand.u32 65535, %v710_v1  ;;  %v49_v4 = vshrl.u32 %v710_v1, 16  ;;  %591 = vset.pattern.permute.xlu1 %v712_v2  ;;  %592 = vset.pattern.permute.xlu2 %v712_v2  ;;  %v84_v22 = vadd.f32 %v83_v16, %v82_v13  ;;  %v91_v27 = vadd.f32 %v90_v19, %v89_v14 }
   0xa   :  { %593 = vset.pattern.permute.xlu0 %v712_v2 }
   0xb   :  { %v51_v5 = vmul.u32 52429, %v48_v3  ;;  %v52_v6 = vmul.u32 52428, %v48_v3  ;;  %v53_v7 = vmul.u32 52429, %v49_v4  ;;  %v54_v10 = vmul.u32 52428, %v49_v4 }
   0xc   :  { %v85_v26 = vrot.slane %v84_v22, 2  ;;  %v92_v31 = vrot.slane %v91_v27, 2 }
   0xd   :  { %v55_v11 = vshll.u32 %v52_v6, 16  ;;  %v57_v12 = vshll.u32 %v53_v7, 16  ;;  %v56_v20 = vshrl.u32 %v52_v6, 16  ;;  %v58_v24 = vshrl.u32 %v53_v7, 16 }
   0xe   :  { %v86_v30 = vadd.f32 %v85_v26, %v84_v22  ;;  %v93_v35 = vadd.f32 %v92_v31, %v91_v27 }
   0xf   :  { %vm59_vm1 = vc.u32 %v51_v5, %v55_v11  ;;  %v61_v15 = vadd.s32 %v55_v11, %v51_v5  ;;  %v38_v11 = vld [vmem:[#allocation2] sm:$0x3] }
  0x10   :  { %v60_v18 = vsel %vm59_vm1, 1, %v672_v17  ;;  %v87_v34 = vrot.slane %v86_v30, 1  ;;  %v94_v39 = vrot.slane %v93_v35, 1 }
  0x11   :  { %v62_v21 = vadd.s32 %v60_v18, %v54_v10  ;;  %vm63_vm2 = vc.u32 %v61_v15, %v57_v12 }
  0x12   :  { %v64_v23 = vsel %vm63_vm2, 1, %v672_v17  ;;  %v88_v38 = vadd.f32 %v87_v34, %v86_v30  ;;  %v95_v44 = vadd.f32 %v94_v39, %v93_v35 }
  0x13   :  { %v66_v25 = vadd.s32 %v64_v23, %v62_v21 }
  0x15   :  { %v67_v28 = vadd.s32 %v66_v25, %v56_v20 }
  0x17   :  { %v68_v29 = vadd.s32 %v67_v28, %v58_v24 }
  0x19   :  { %v69_v32 = vshrl.u32 %v68_v29, 2 }
  0x1b   :  { %v70_v33 = vmul.u32 5, %v69_v32 }
  0x1d   :  { %v71_v36 = vsub.s32 %v710_v1, %v70_v33 }
  0x1f   :  { %vm74_vm3 = vcmp.ne.s32.totalorder %v71_v36, 0  ;;  %vm75_vm4 = vcmp.lt.s32.totalorder %v71_v36, 0  ;;  %v77_v37 = vadd.s32 5, %v71_v36 }
  0x20   :  { %vm76_vm5 = vmand %vm75_vm4, %vm74_vm3  ;;  %vm312_vm3 = vcmask 1041409   ;;  %vm314_vm4 = vcmask 1042434  }
  0x21   :  { %v78_v40 = vsel %vm76_vm5, %v77_v37, %v71_v36  ;;  %vm316_vm5 = vcmask 1043459  }
  0x22   :  { %vm79_vm6 = vcmp.eq.s32.totalorder %v78_v40, %v712_v2 }
  0x23   :  { %v737_v42 = vsel %vm79_vm6, 1.0, %v673_v41  ;;  %vm323_vm6 = vcmask 60416  }
  0x24   :  { %v96_v43 = vmul.f32 %v88_v38, %v737_v42  ;;  %v97_v46 = vmul.f32 %v95_v44, %v737_v42 }
  0x26   :  { %v99_v45 = vsel %vm98_vm7, %v96_v43, 0.0  ;;  %v102_v47 = vsel %vm98_vm7, %v97_v46, 0.0 }
  0x27   :  { %100 = vadd.xlane.f32.xlu0 %v99_v45 }
  0x2f   :  { %103 = vadd.xlane.f32.xlu0 %v102_v47 }
  0x9a   :  { %v101_v49 = vpop.xlane.xlu0 %100 }
  0x9b   :  { %v105_v50 = vmul.f32 0.0078125, %v101_v49 }
  0x9d   :  { %v107_v51 = vmul.f32 %v105_v50, %v37_v48  ;;  %v39_v50 = vld [vmem:[%s845_s3] sm:$0xf]  ;;  %s674_s3 = smov [#allocation5]  }
  0x9f   :  { %v110_v52 = vsel %vm109_vm8, %v107_v51, 0.0 }
  0xa0   :  { %v111_v53 = vrot.slane %v110_v52, 4 }
  0xa2   :  { %v112_v54 = vadd.f32 %v111_v53, %v110_v52  ;;  %v104_v55 = vpop.xlane.xlu0 %103  ;;  %v239_v52 = vperm.slane %v39_v50, 1 }
  0xa3   :  { %v106_v56 = vmul.f32 0.0078125, %v104_v55 }
  0xa4   :  { %v113_v57 = vrot.slane %v112_v54, 2  ;;  %244 = vperm.xlu0 %593, %v239_v52  }
  0xa5   :  { %v108_v58 = vmul.f32 %v106_v56, %v37_v48  ;;  %v753_v56 = vld [vmem:[%s846_s4] sm:$0xff]  ;;  %s566_s4 = sshll.u32 %s674_s3, 4  ;;  %s567_s4 = int_to_ptr.vmem [resolvable:$true] %s566_s4 }
  0xa6   :  { %v114_v59 = vadd.f32 %v113_v57, %v112_v54 }
  0xa7   :  { %v117_v60 = vsel %vm109_vm8, %v108_v58, 0.0  ;;  %vm500_vm8 = vcmask 1046534  }
  0xa8   :  { %v118_v61 = vrot.slane %v117_v60, 4  ;;  %v115_v62 = vrot.slane %v114_v59, 1 }
  0xaa   :  { %v119_v63 = vadd.f32 %v118_v61, %v117_v60  ;;  %v116_v0 = vadd.f32 %v115_v62, %v114_v59  ;;  %v333_v60 = vperm.slane %v753_v56, 0  ;;  %v232_v62 = vperm.slane %v39_v50, 0 }
  0xac   :  { %v120_v3 = vrot.slane %v119_v63, 2  ;;  %v124_v4 = vmax.f32 %v116_v0, 0.0  ;;  %338 = vperm.xlu0 %593, %v333_v60   ;;  %v253_v0 = vperm.slane %v39_v50, 3 }
  0xae   :  { %130 = vperm.xlu1 %591, %v124_v4   ;;  %v121_v5 = vadd.f32 %v120_v3, %v119_v63  ;;  %v246_v63 = vperm.slane %v39_v50, 2 }
  0xb0   :  { %v122_v6 = vrot.slane %v121_v5, 1 }
  0xb2   :  { %v123_v7 = vadd.f32 %v122_v6, %v121_v5 }
  0xb4   :  { %v125_v10 = vmax.f32 %v123_v7, 0.0  ;;  %596 = vset.pattern.permute.xlu0 %v672_v17 }
  0xb6   :  { %136 = vperm.xlu1 %591, %v125_v10  }
  0xbe   :  { %595 = vset.pattern.permute.xlu1 %v672_v17 }
 0x120   :  { %v131_v12 = vpop.permute.xlu1 %130 }
 0x121   :  { %v138_v13 = vmul.f32 %v131_v12, %v38_v11 }
 0x123   :  { %v141_v14 = vsel %vm140_vm9, %v138_v13, 0.0 }
 0x124   :  { %v142_v15 = vrot.slane %v141_v14, 4 }
 0x126   :  { %v143_v16 = vadd.f32 %v142_v15, %v141_v14 }
 0x128   :  { %v144_v18 = vrot.slane %v143_v16, 2  ;;  %v137_v19 = vpop.permute.xlu1 %136 }
 0x129   :  { %v139_v20 = vmul.f32 %v137_v19, %v38_v11 }
 0x12a   :  { %v145_v21 = vadd.f32 %v144_v18, %v143_v16 }
 0x12b   :  { %v148_v22 = vsel %vm140_vm9, %v139_v20, 0.0  ;;  %vm498_vm9 = vcmask 1045509  }
 0x12c   :  { %v146_v23 = vrot.slane %v145_v21, 1  ;;  %v149_v24 = vrot.slane %v148_v22, 4 }
 0x12e   :  { %v147_v25 = vadd.f32 %v146_v23, %v145_v21  ;;  %v150_v26 = vadd.f32 %v149_v24, %v148_v22 }
 0x130   :  { %v581_v27 = vmul.f32 -1.442695, %v147_v25  ;;  %v151_v28 = vrot.slane %v150_v26, 2 }
 0x132   :  { %603 = vpow2.f32 %v581_v27  ;;  %v152_v29 = vadd.f32 %v151_v28, %v150_v26  ;;  %v245_v28 = vpop.permute.xlu0 %244 }
 0x134   :  { %v153_v30 = vrot.slane %v152_v29, 1 }
 0x136   :  { %v154_v31 = vadd.f32 %v153_v30, %v152_v29 }
 0x138   :  { %v604_v32 = vpop.eup %603  ;;  %v582_v33 = vmul.f32 -1.442695, %v154_v31 }
 0x139   :  { %v161_v34 = vadd.f32 1.0, %v604_v32 }
 0x13a   :  { %605 = vpow2.f32 %v582_v33  ;;  %v772_v30 = vpop.permute.xlu0 %338 }
 0x13b   :  { %607 = vrcp.f32 %v161_v34  ;;  %v174_v40 = vand.u32 2147483648, %v161_v34  ;;  %v172_v43 = vand.u32 2147483647, %v161_v34  ;;  %vm168_vm11 = vweird.f32 %v161_v34 }
 0x13d   :  { %v175_v46 = vor.u32 1.1754944e-38, %v174_v40  ;;  %vm173_vm13 = vcmp.eq.f32.partialorder %v172_v43, 8.507059e+37 }
 0x140   :  { %v606_v35 = vpop.eup %605 }
 0x141   :  { %v608_v36 = vpop.eup %607  ;;  %v162_v37 = vadd.f32 1.0, %v606_v35 }
 0x142   :  { %v164_v38 = vmul.f32 %v608_v36, %v161_v34  ;;  %vm169_vm10 = vweird.f32 %v608_v36 }
 0x143   :  { %609 = vrcp.f32 %v162_v37  ;;  %vm170_vm12 = vmor %vm168_vm11, %vm169_vm10  ;;  %v189_v53 = vand.u32 2147483648, %v162_v37  ;;  %v187_v55 = vand.u32 2147483647, %v162_v37  ;;  %vm183_vm15 = vweird.f32 %v162_v37 }
 0x144   :  { %v165_v39 = vsub.f32 1.0, %v164_v38  ;;  %vm502_vm10 = vcmask 1047559   ;;  %vm513_vm11 = vcmask 31744  }
 0x145   :  { %v190_v58 = vor.u32 1.1754944e-38, %v189_v53  ;;  %vm188_vm2 = vcmp.eq.f32.partialorder %v187_v55, 8.507059e+37 }
 0x146   :  { %v166_v41 = vmul.f32 %v608_v36, %v165_v39 }
 0x148   :  { %v167_v44 = vadd.f32 %v608_v36, %v166_v41  ;;  %v340_v41 = vperm.slane %v753_v56, 1 }
 0x149   :  { %v610_v45 = vpop.eup %609 }
 0x14a   :  { %v171_v47 = vsel %vm170_vm12, %v608_v36, %v167_v44  ;;  %v179_v48 = vmul.f32 %v610_v45, %v162_v37  ;;  %vm184_vm14 = vweird.f32 %v610_v45  ;;  %v361_v44 = vperm.slane %v753_v56, 4 }
 0x14b   :  { %v176_v49 = vsel %vm173_vm13, %v175_v46, %v171_v47  ;;  %vm185_vm1 = vmor %vm183_vm15, %vm184_vm14  ;;  %v347_v46 = vperm.slane %v753_v56, 2  ;;  %v354_v47 = vperm.slane %v753_v56, 3 }
 0x14c   :  { %197 = vperm.xlu2 %592, %v176_v49   ;;  %v180_v51 = vsub.f32 1.0, %v179_v48  ;;  %v375_v48 = vperm.slane %v753_v56, 6 }
 0x14e   :  { %v181_v54 = vmul.f32 %v610_v45, %v180_v51 }
 0x150   :  { %v182_v57 = vadd.f32 %v610_v45, %v181_v54 }
 0x152   :  { %v186_v59 = vsel %vm185_vm1, %v610_v45, %v182_v57  ;;  %v368_v45 = vperm.slane %v753_v56, 5 }
 0x153   :  { %v191_v61 = vsel %vm188_vm2, %v190_v58, %v186_v59 }
 0x154   :  { %203 = vperm.xlu2 %592, %v191_v61  }
 0x15c   :  { %237 = vperm.xlu2 %592, %v232_v62  }
 0x164   :  { %251 = vperm.xlu2 %592, %v246_v63  }
 0x16c   :  { %258 = vperm.xlu2 %592, %v253_v0  }
 0x174   :  { %594 = vset.pattern.permute.xlu2 %v672_v17 }
 0x1a6   :  { %v198_v3 = vpop.permute.xlu2 %197 }
 0x1a7   :  { %v205_v4 = vmul.f32 %v198_v3, %v737_v42 }
 0x1a9   :  { %v207_v5 = vsel %vm98_vm7, %v205_v4, 0.0 }
 0x1aa   :  { %v208_v6 = vrot.slane %v207_v5, 4 }
 0x1ac   :  { %v209_v7 = vadd.f32 %v208_v6, %v207_v5 }
 0x1ae   :  { %v210_v10 = vrot.slane %v209_v7, 2  ;;  %v204_v11 = vpop.permute.xlu2 %203 }
 0x1af   :  { %v206_v12 = vmul.f32 %v204_v11, %v737_v42 }
 0x1b0   :  { %v211_v13 = vadd.f32 %v210_v10, %v209_v7 }
 0x1b1   :  { %v214_v14 = vsel %vm98_vm7, %v206_v12, 0.0  ;;  %vm496_vm7 = vcmask 1044484  }
 0x1b2   :  { %v215_v15 = vrot.slane %v214_v14, 4  ;;  %v212_v16 = vrot.slane %v211_v13, 1 }
 0x1b4   :  { %v216_v18 = vadd.f32 %v215_v15, %v214_v14  ;;  %v213_v19 = vadd.f32 %v212_v16, %v211_v13 }
 0x1b6   :  { %v217_v20 = vrot.slane %v216_v18, 2  ;;  %v763_v21 = vmul.f32 %v213_v19, %v722_v8  ;;  %v238_v27 = vpop.permute.xlu2 %237 }
 0x1b8   :  { %v218_v22 = vadd.f32 %v217_v20, %v216_v18  ;;  %v223_v23 = vsel %vm81_vm0, %v763_v21, 0.0 }
 0x1b9   :  { %224 = vadd.xlane.f32.xlu0 %v223_v23 }
 0x1ba   :  { %v219_v24 = vrot.slane %v218_v22, 1 }
 0x1bc   :  { %v220_v25 = vadd.f32 %v219_v24, %v218_v22 }
 0x1be   :  { %v768_v42 = vmul.f32 %v220_v25, %v727_v9  ;;  %v252_v29 = vpop.permute.xlu2 %251 }
 0x1c0   :  { %v226_v26 = vsel %vm81_vm0, %v768_v42, 0.0 }
 0x1c1   :  { %227 = vadd.xlane.f32.xlu1 %v226_v26 }
 0x1c6   :  { %v259_v32 = vpop.permute.xlu2 %258 }
 0x22c   :  { %v225_v8 = vpop.xlane.xlu0 %224 }
 0x22d   :  { %v229_v31 = vmul.f32 0.0125, %v225_v8 }
 0x22f   :  { %v267_v33 = vmul.f32 %v259_v32, %v229_v31  ;;  %v264_v34 = vmul.f32 %v238_v27, %v229_v31  ;;  %v265_v37 = vmul.f32 %v245_v28, %v229_v31  ;;  %v266_v39 = vmul.f32 %v252_v29, %v229_v31 }
 0x231   :  { %290 = vperm.xlu1 %595, %v267_v33   ;;  %281 = vperm.xlu2 %594, %v264_v34  }
 0x234   :  { %v228_v35 = vpop.xlane.xlu1 %227 }
 0x235   :  { %v230_v36 = vmul.f32 0.0125, %v228_v35 }
 0x237   :  { %v268_v9 = vmul.f32 %v238_v27, %v230_v36  ;;  %v271_v38 = vmul.f32 %v259_v32, %v230_v36  ;;  %v269_v40 = vmul.f32 %v245_v28, %v230_v36  ;;  %v270_v43 = vmul.f32 %v252_v29, %v230_v36 }
 0x239   :  { %293 = vperm.xlu0 %596, %v268_v9   ;;  %284 = vperm.xlu2 %594, %v265_v37  }
 0x23a   :  { %599 = vset.pattern.permute.xlu1 %v712_v2 }
 0x241   :  { %302 = vperm.xlu0 %596, %v271_v38   ;;  %287 = vperm.xlu2 %594, %v266_v39  }
 0x242   :  { %373 = vperm.xlu1 %599, %v368_v45  }
 0x249   :  { %296 = vperm.xlu2 %594, %v269_v40   ;;  %597 = vset.pattern.permute.xlu0 %v712_v2 }
 0x24a   :  { %602 = vset.pattern.permute.xlu1 %v672_v17 }
 0x251   :  { %299 = vperm.xlu2 %594, %v270_v43   ;;  %345 = vperm.xlu0 %597, %v340_v41  }
 0x259   :  { %598 = vset.pattern.permute.xlu2 %v712_v2  ;;  %352 = vperm.xlu0 %597, %v347_v46   ;;  %v382_v2 = vperm.slane %v753_v56, 7 }
 0x261   :  { %366 = vperm.xlu2 %598, %v361_v44   ;;  %359 = vperm.xlu0 %597, %v354_v47  }
 0x269   :  { %601 = vset.pattern.permute.xlu2 %v672_v17  ;;  %380 = vperm.xlu0 %597, %v375_v48  }
 0x271   :  { %387 = vperm.xlu0 %597, %v382_v2  }
 0x279   :  { %600 = vset.pattern.permute.xlu0 %v672_v17 }
 0x28b   :  { %v282_v49 = vpop.permute.xlu2 %281 }
 0x28c   :  { %v304_v54 = vperm.slane %v282_v49, %v710_v1 }
 0x293   :  { %v285_v50 = vpop.permute.xlu2 %284 }
 0x294   :  { %v305_v52 = vperm.slane %v285_v50, %v710_v1 }
 0x296   :  { %v313_v57 = vsel %vm312_vm3, %v305_v52, %v304_v54 }
 0x29b   :  { %v288_v51 = vpop.permute.xlu2 %287 }
 0x29c   :  { %v306_v53 = vperm.slane %v288_v51, %v710_v1 }
 0x29e   :  { %v315_v17 = vsel %vm314_vm4, %v306_v53, %v313_v57 }
 0x2a3   :  { %v291_v55 = vpop.permute.xlu1 %290  ;;  %v297_v58 = vpop.permute.xlu2 %296 }
 0x2a4   :  { %v307_v56 = vperm.slane %v291_v55, %v710_v1  ;;  %v309_v0 = vperm.slane %v297_v58, %v710_v1 }
 0x2a6   :  { %v317_v59 = vsel %vm316_vm5, %v307_v56, %v315_v17 }
 0x2a7   :  { %v324_v60 = vsel %vm323_vm6, %v317_v59, 0.0 }
 0x2a8   :  { %325 = vadd.xlane.f32.xlu2 %v324_v60 }
 0x2ab   :  { %v294_v61 = vpop.permute.xlu0 %293  ;;  %v300_v62 = vpop.permute.xlu2 %299 }
 0x2ac   :  { %v308_v63 = vperm.slane %v294_v61, %v710_v1  ;;  %v310_v3 = vperm.slane %v300_v62, %v710_v1 }
 0x2ae   :  { %v318_v4 = vsel %vm312_vm3, %v309_v0, %v308_v63 }
 0x2af   :  { %v319_v7 = vsel %vm314_vm4, %v310_v3, %v318_v4 }
 0x2b3   :  { %v303_v5 = vpop.permute.xlu0 %302 }
 0x2b4   :  { %v311_v6 = vperm.slane %v303_v5, %v710_v1  ;;  %v374_v19 = vpop.permute.xlu1 %373 }
 0x2b6   :  { %v320_v10 = vsel %vm316_vm5, %v311_v6, %v319_v7 }
 0x2b7   :  { %v327_v11 = vsel %vm323_vm6, %v320_v10, 0.0 }
 0x2b8   :  { %328 = vadd.xlane.f32.xlu1 %v327_v11 }
 0x2bb   :  { %v367_v12 = vpop.permute.xlu2 %366 }
 0x2c3   :  { %v346_v14 = vpop.permute.xlu0 %345 }
 0x2cb   :  { %v353_v20 = vpop.permute.xlu0 %352 }
 0x2d3   :  { %v360_v27 = vpop.permute.xlu0 %359 }
 0x2db   :  { %v381_v31 = vpop.permute.xlu0 %380 }
 0x31b   :  { %v326_v13 = vpop.xlane.xlu2 %325 }
 0x31c   :  { %v330_v15 = vmax.f32 %v326_v13, 0.0 }
 0x31e   :  { %v397_v16 = vmul.f32 %v772_v30, %v330_v15  ;;  %v398_v18 = vmul.f32 %v346_v14, %v330_v15  ;;  %v399_v28 = vmul.f32 %v353_v20, %v330_v15  ;;  %v400_v29 = vmul.f32 %v360_v27, %v330_v15 }
 0x31f   :  { %v401_v8 = vmul.f32 %v367_v12, %v330_v15  ;;  %v402_v35 = vmul.f32 %v374_v19, %v330_v15  ;;  %v403_v36 = vmul.f32 %v381_v31, %v330_v15 }
 0x320   :  { %430 = vperm.xlu0 %600, %v397_v16   ;;  %433 = vperm.xlu2 %601, %v398_v18  }
 0x32b   :  { %v329_v22 = vpop.xlane.xlu1 %328 }
 0x32c   :  { %v331_v23 = vmax.f32 %v329_v22, 0.0 }
 0x32e   :  { %v405_v24 = vmul.f32 %v772_v30, %v331_v23  ;;  %v406_v25 = vmul.f32 %v346_v14, %v331_v23  ;;  %v407_v26 = vmul.f32 %v353_v20, %v331_v23  ;;  %v408_v32 = vmul.f32 %v360_v27, %v331_v23  ;;  %v388_v30 = vpop.permute.xlu0 %387 }
 0x32f   :  { %v409_v33 = vmul.f32 %v367_v12, %v331_v23  ;;  %v410_v34 = vmul.f32 %v374_v19, %v331_v23  ;;  %v404_v9 = vmul.f32 %v388_v30, %v330_v15  ;;  %v411_v37 = vmul.f32 %v381_v31, %v331_v23 }
 0x330   :  { %454 = vperm.xlu1 %602, %v405_v24   ;;  %457 = vperm.xlu2 %601, %v406_v25   ;;  %v412_v38 = vmul.f32 %v388_v30, %v331_v23 }
 0x331   :  { %460 = vperm.xlu0 %600, %v407_v26  }
 0x338   :  { %436 = vperm.xlu1 %602, %v399_v28   ;;  %439 = vperm.xlu2 %601, %v400_v29  }
 0x339   :  { %442 = vperm.xlu0 %600, %v401_v8  }
 0x340   :  { %463 = vperm.xlu1 %602, %v408_v32   ;;  %466 = vperm.xlu2 %601, %v409_v33  }
 0x341   :  { %469 = vperm.xlu0 %600, %v410_v34  }
 0x348   :  { %445 = vperm.xlu1 %602, %v402_v35   ;;  %448 = vperm.xlu2 %601, %v403_v36  }
 0x349   :  { %451 = vperm.xlu0 %600, %v404_v9  }
 0x350   :  { %472 = vperm.xlu1 %602, %v411_v37   ;;  %475 = vperm.xlu2 %601, %v412_v38  }
 0x37a   :  { %v434_v39 = vpop.permute.xlu2 %433 }
 0x37b   :  { %v478_v51 = vperm.slane %v434_v39, %v710_v1 }
 0x38a   :  { %v458_v40 = vpop.permute.xlu2 %457 }
 0x38b   :  { %v486_v58 = vperm.slane %v458_v40, %v710_v1 }
 0x392   :  { %v431_v41 = vpop.permute.xlu0 %430  ;;  %v440_v44 = vpop.permute.xlu2 %439 }
 0x393   :  { %v477_v2 = vperm.slane %v431_v41, %v710_v1  ;;  %v480_v57 = vperm.slane %v440_v44, %v710_v1 }
 0x395   :  { %v493_v53 = vsel %vm312_vm3, %v478_v51, %v477_v2 }
 0x39a   :  { %v467_v48 = vpop.permute.xlu2 %466 }
 0x39b   :  { %v489_v13 = vperm.slane %v467_v48, %v710_v1 }
 0x3a2   :  { %v455_v43 = vpop.permute.xlu1 %454  ;;  %v449_v56 = vpop.permute.xlu2 %448 }
 0x3a3   :  { %v461_v45 = vpop.permute.xlu0 %460  ;;  %v485_v54 = vperm.slane %v455_v43, %v710_v1  ;;  %v483_v4 = vperm.slane %v449_v56, %v710_v1 }
 0x3a4   :  { %v487_v17 = vperm.slane %v461_v45, %v710_v1 }
 0x3a5   :  { %v504_v60 = vsel %vm312_vm3, %v486_v58, %v485_v54 }
 0x3a6   :  { %v505_v6 = vsel %vm314_vm4, %v487_v17, %v504_v60 }
 0x3aa   :  { %v437_v46 = vpop.permute.xlu1 %436  ;;  %v476_v16 = vpop.permute.xlu2 %475 }
 0x3ab   :  { %v443_v47 = vpop.permute.xlu0 %442  ;;  %v479_v49 = vperm.slane %v437_v46, %v710_v1  ;;  %v492_v23 = vperm.slane %v476_v16, %v710_v1 }
 0x3ac   :  { %v481_v61 = vperm.slane %v443_v47, %v710_v1 }
 0x3ad   :  { %v494_v55 = vsel %vm314_vm4, %v479_v49, %v493_v53 }
 0x3ae   :  { %v495_v59 = vsel %vm316_vm5, %v480_v57, %v494_v55 }
 0x3af   :  { %v497_v5 = vsel %vm496_vm7, %v481_v61, %v495_v59 }
 0x3b2   :  { %v464_v50 = vpop.permute.xlu1 %463 }
 0x3b3   :  { %v470_v52 = vpop.permute.xlu0 %469  ;;  %v488_v62 = vperm.slane %v464_v50, %v710_v1 }
 0x3b4   :  { %v490_v19 = vperm.slane %v470_v52, %v710_v1 }
 0x3b5   :  { %v506_v11 = vsel %vm316_vm5, %v488_v62, %v505_v6 }
 0x3b6   :  { %v507_v18 = vsel %vm496_vm7, %v489_v13, %v506_v11 }
 0x3b7   :  { %v508_v24 = vsel %vm498_vm9, %v490_v19, %v507_v18 }
 0x3ba   :  { %v446_v63 = vpop.permute.xlu1 %445 }
 0x3bb   :  { %v482_v0 = vperm.slane %v446_v63, %v710_v1  ;;  %v452_v3 = vpop.permute.xlu0 %451 }
 0x3bc   :  { %v484_v10 = vperm.slane %v452_v3, %v710_v1 }
 0x3bd   :  { %v499_v7 = vsel %vm498_vm9, %v482_v0, %v497_v5 }
 0x3be   :  { %v501_v12 = vsel %vm500_vm8, %v483_v4, %v499_v7 }
 0x3bf   :  { %v503_v14 = vsel %vm502_vm10, %v484_v10, %v501_v12 }
 0x3c0   :  { %v514_v15 = vsel %vm513_vm11, %v503_v14, 0.0 }
 0x3c1   :  { %515 = vadd.xlane.f32.xlu1 %v514_v15 }
 0x3c2   :  { %v473_v20 = vpop.permute.xlu1 %472 }
 0x3c3   :  { %v491_v22 = vperm.slane %v473_v20, %v710_v1 }
 0x3c5   :  { %v509_v25 = vsel %vm500_vm8, %v491_v22, %v508_v24 }
 0x3c6   :  { %v510_v26 = vsel %vm502_vm10, %v492_v23, %v509_v25 }
 0x3c7   :  { %v517_v27 = vsel %vm513_vm11, %v510_v26, 0.0 }
 0x3c8   :  { %518 = vadd.xlane.f32.xlu0 %v517_v27 }
 0x434   :  { %v516_v28 = vpop.xlane.xlu1 %515 }
 0x435   :  { %v583_v29 = vmul.f32 -1.442695, %v516_v28 }
 0x437   :  { %611 = vpow2.f32 %v583_v29 }
 0x43b   :  { %v519_v8 = vpop.xlane.xlu0 %518 }
 0x43c   :  { %v584_v31 = vmul.f32 -1.442695, %v519_v8 }
 0x43d   :  { %v612_v32 = vpop.eup %611 }
 0x43e   :  { %v526_v33 = vadd.f32 1.0, %v612_v32  ;;  %613 = vpow2.f32 %v584_v31 }
 0x440   :  { %615 = vrcp.f32 %v526_v33  ;;  %v539_v9 = vand.u32 2147483648, %v526_v33  ;;  %v537_v38 = vand.u32 2147483647, %v526_v33  ;;  %vm533_vm13 = vweird.f32 %v526_v33 }
 0x442   :  { %v540_v41 = vor.u32 1.1754944e-38, %v539_v9  ;;  %vm538_vm15 = vcmp.eq.f32.partialorder %v537_v38, 8.507059e+37 }
 0x444   :  { %v614_v34 = vpop.eup %613 }
 0x445   :  { %v527_v1 = vadd.f32 1.0, %v614_v34 }
 0x446   :  { %v616_v30 = vpop.eup %615 }
 0x447   :  { %v529_v35 = vmul.f32 %v616_v30, %v526_v33  ;;  %617 = vrcp.f32 %v527_v1  ;;  %vm534_vm12 = vweird.f32 %v616_v30  ;;  %v554_v47 = vand.u32 2147483648, %v527_v1 }
 0x448   :  { %vm535_vm14 = vmor %vm533_vm13, %vm534_vm12  ;;  %v552_v49 = vand.u32 2147483647, %v527_v1  ;;  %vm548_vm2 = vweird.f32 %v527_v1 }
 0x449   :  { %v530_v36 = vsub.f32 1.0, %v529_v35  ;;  %v555_v51 = vor.u32 1.1754944e-38, %v554_v47 }
 0x44a   :  { %vm553_vm4 = vcmp.eq.f32.partialorder %v552_v49, 8.507059e+37 }
 0x44b   :  { %v531_v37 = vmul.f32 %v616_v30, %v530_v36 }
 0x44d   :  { %v618_v39 = vpop.eup %617  ;;  %v532_v40 = vadd.f32 %v616_v30, %v531_v37 }
 0x44e   :  { %v544_v43 = vmul.f32 %v618_v39, %v527_v1  ;;  %vm549_vm1 = vweird.f32 %v618_v39 }
 0x44f   :  { %v536_v44 = vsel %vm535_vm14, %v616_v30, %v532_v40  ;;  %vm550_vm3 = vmor %vm548_vm2, %vm549_vm1 }
 0x450   :  { %v545_v45 = vsub.f32 1.0, %v544_v43  ;;  %v541_v46 = vsel %vm538_vm15, %v540_v41, %v536_v44 }
 0x451   :  { %v558_v48 = vmul.f32 %v541_v46, %v763_v21 }
 0x452   :  { %v546_v2 = vmul.f32 %v618_v39, %v545_v45 }
 0x453   :  { %560 = vst.msk [vmem:[#allocation5] sm:$0xff] %vm81_vm0, %v558_v48 }
 0x454   :  { %v547_v50 = vadd.f32 %v618_v39, %v546_v2 }
 0x456   :  { %v551_v52 = vsel %vm550_vm3, %v618_v39, %v547_v50 }
 0x457   :  { %v556_v53 = vsel %vm553_vm4, %v555_v51, %v551_v52 }
 0x458   :  { %v559_v21 = vmul.f32 %v556_v53, %v768_v42 }
 0x45a   :  { %561 = vst.msk [vmem:[#allocation5 + $0x8] sm:$0xff] %vm81_vm0, %v559_v21 }
 0x45b   :  { %574 = dma.vmem_to_hbm [thread:$0]  %s567_s4, 256, %s569_s7, [#allocation4], %s675_s8, %s675_s8, %s676_s9  }
 0x45c   :  { %669 = dma.done.wait [#allocation4], 256  }
 0x45d   :  { %670 = vsyncadd [#allocation4], 4294967040 }
 0x45e   :  { %579 = vsyncpa [#allocation3], 1 }
 0x45f   :  { %580 = vsyncpa [#allocation4], 1 }

</bundles_post_ra>
